<compile_context>
chip_gen: v6e
topology: v6e:2x2x1
jax: 0.10.0
libtpu: 0.0.40
codegen_flags: <defaults>
</compile_context>

<pallas_src>
import math

import jax
import jax.numpy as jnp
from jax.experimental import pallas as pl
from jax.experimental.pallas import tpu as pltpu


def _round_up(x, m):
    return ((x + m - 1) // m) * m


def _lora_kernel(x_ref, at_ref, bt_ref, o_ref, acc_ref):
    # x_ref:  (tm, tk)      activation tile (compute dtype)
    # at_ref: (tk, r_p)     pre-transposed lora_A slice (A.T)
    # bt_ref: (r_p, N_p)    pre-transposed lora_B (B.T), resident (constant index_map)
    # o_ref:  (tm, N_p)     output tile, resident across the K axis
    # acc_ref:(tm, r_p) f32 accumulator for x @ A.T, persists across K steps
    k = pl.program_id(1)

    @pl.when(k == 0)
    def _():
        acc_ref[...] = jnp.zeros_like(acc_ref)

    acc_ref[...] += jnp.dot(x_ref[...], at_ref[...],
                            preferred_element_type=jnp.float32)

    @pl.when(k == pl.num_programs(1) - 1)
    def _():
        t = acc_ref[...].astype(bt_ref.dtype)          # (tm, r_p)
        o = jnp.dot(t, bt_ref[...], preferred_element_type=jnp.float32)
        o_ref[...] = o.astype(o_ref.dtype)


def lora_linear(x, lora_A, lora_B, *, tm=256, k_block=None,
                compute_dtype=jnp.bfloat16,
                vmem_cap_bytes=48 * 1024 * 1024):
    """x: (..., in_features) -> (..., out_features).  out = x @ A.T @ B.T"""
    r, K = lora_A.shape
    N, r2 = lora_B.shape
    assert r == r2
    out_dtype = x.dtype

    lead = x.shape[:-1]
    x2d = x.reshape(-1, K)
    M = x2d.shape[0]

    csz = jnp.dtype(compute_dtype).itemsize
    osz = jnp.dtype(out_dtype).itemsize

    # ---- TPU-friendly padded sizes (zero padding is numerically exact). ----
    sub_granule = max(8, 8 * 4 // csz)        # 8 for f32, 16 for bf16
    r_p = _round_up(max(r, sub_granule), sub_granule)
    N_p = _round_up(N, 128)                   # lane-dense output (unmasked vst)

    # K tiling: single full-K block unless K is large (or caller overrides).
    if k_block is None:
        k_block = 512 if K > 2048 else K
    if k_block >= K:
        tk, K_p = K, K                        # block == full array dim (always legal)
    else:
        tk = _round_up(k_block, 128)          # interior K block: lane-aligned
        K_p = _round_up(K, tk)

    # Row tile: big, but no bigger than (padded) M, and VMEM-budgeted.
    def _vmem_est(tm_):
        return (2 * tm_ * tk * csz            # x tile (double buffered)
                + 2 * tk * r_p * csz          # A.T slice
                + 2 * r_p * N_p * csz         # B.T (resident)
                + 2 * tm_ * N_p * osz         # output tile
                + tm_ * r_p * 4)              # f32 accumulator

    tm_eff = min(tm, _round_up(M, 8))
    while tm_eff > 8 and _vmem_est(tm_eff) > vmem_cap_bytes:
        tm_eff = _round_up(tm_eff // 2, 8)
    M_p = _round_up(M, tm_eff)

    vmem_limit = min(vmem_cap_bytes,
                     max(32 * 1024 * 1024, int(_vmem_est(tm_eff) * 2)))

    # ---- One-time layout work in XLA: cast + transpose + zero-pad. ----------
    x_c = x2d.astype(compute_dtype)
    x_p = jnp.pad(x_c, ((0, M_p - M), (0, K_p - K))) \
        if (M_p != M or K_p != K) else x_c
    a_t = jnp.pad(lora_A.T.astype(compute_dtype),
                  ((0, K_p - K), (0, r_p - r)))
    b_t = jnp.pad(lora_B.T.astype(compute_dtype),
                  ((0, r_p - r), (0, N_p - N)))

    grid = (M_p // tm_eff, K_p // tk)

    cost = pl.CostEstimate(
        flops=2 * M_p * K_p * r_p + 2 * M_p * r_p * N_p,
        transcendentals=0,
        bytes_accessed=(M_p * K_p + K_p * r_p + r_p * N_p) * csz
                       + M_p * N_p * osz,
    )

    out2d = pl.pallas_call(
        _lora_kernel,
        out_shape=jax.ShapeDtypeStruct((M_p, N_p), out_dtype),
        grid_spec=pltpu.PrefetchScalarGridSpec(
            num_scalar_prefetch=0,
            grid=grid,
            in_specs=[
                pl.BlockSpec((tm_eff, tk), lambda i, k: (i, k)),   # x rows
                pl.BlockSpec((tk, r_p), lambda i, k: (k, 0)),      # A.T slice
                pl.BlockSpec((r_p, N_p), lambda i, k: (0, 0)),     # B.T (resident)
            ],
            out_specs=pl.BlockSpec((tm_eff, N_p), lambda i, k: (i, 0)),
            scratch_shapes=[pltpu.VMEM((tm_eff, r_p), jnp.float32)],
        ),
        compiler_params=pltpu.CompilerParams(
            dimension_semantics=("parallel", "arbitrary"),
            vmem_limit_bytes=vmem_limit,
        ),
        cost_estimate=cost,
    )(x_p, a_t, b_t)

    return out2d[:M, :N].reshape(*lead, N)


def init_lora_params(key, in_features, out_features, r, dtype=jnp.float32):
    # Matches nn.init.kaiming_uniform_(lora_A, a=sqrt(5)):
    #   gain = sqrt(2 / (1 + a^2)) = sqrt(1/3); bound = gain * sqrt(3 / fan_in)
    #        = 1 / sqrt(in_features)
    bound = 1.0 / math.sqrt(in_features)
    lora_A = jax.random.uniform(key, (r, in_features), dtype=dtype,
                                minval=-bound, maxval=bound)
    lora_B = jnp.zeros((out_features, r), dtype=dtype)  # nn.init.zeros_
    return lora_A, lora_B


if __name__ == "__main__":
    key = jax.random.PRNGKey(0)
    k_x, k_a, k_b, k_x2, k_a3, k_b3, k_x3 = jax.random.split(key, 7)

    batch, seq = 2, 8
    in_features, out_features, r = 32, 32, 4

    x = jax.random.normal(k_x, (batch, seq, in_features), dtype=jnp.float32)
    lora_A, lora_B = init_lora_params(k_a, in_features, out_features, r)

    # 1) PyTorch-style init (lora_B == 0)  ->  output must be exactly zero.
    out0 = jax.block_until_ready(lora_linear(x, lora_A, lora_B))
    assert out0.shape == (batch, seq, out_features)
    assert out0.dtype == x.dtype
    assert jnp.allclose(out0, jnp.zeros_like(out0), atol=1e-6)

    # 2) Non-trivial lora_B  ->  compare against the pure-JAX f32 reference
    #    (kernel computes on the MXU in bf16 with f32 accumulation).
    lora_B_nz = 0.3 * jax.random.normal(k_b, (out_features, r),
                                        dtype=jnp.float32)
    out = jax.block_until_ready(lora_linear(x, lora_A, lora_B_nz))
    ref = x @ lora_A.T @ lora_B_nz.T
    assert out.shape == ref.shape
    assert jnp.allclose(out, ref, atol=3e-2, rtol=3e-2)

    # 3) Ragged leading dims (M not a multiple of the tile) -> padding path.
    x_ragged = jax.random.normal(k_x2, (3, 5, in_features), dtype=jnp.float32)
    out_r = jax.block_until_ready(lora_linear(x_ragged, lora_A, lora_B_nz))
    ref_r = x_ragged @ lora_A.T @ lora_B_nz.T
    assert out_r.shape == (3, 5, out_features)
    assert jnp.allclose(out_r, ref_r, atol=3e-2, rtol=3e-2)

    # 4) Multi-step K axis (exercise the accumulator / pl.when phases) at a
    #    small scale by forcing a 128-wide K block.
    in3, out3, r3 = 256, 64, 8
    x3 = jax.random.normal(k_x3, (batch, seq, in3), dtype=jnp.float32)
    lora_A3, _ = init_lora_params(k_a3, in3, out3, r3)
    lora_B3 = 0.3 * jax.random.normal(k_b3, (out3, r3), dtype=jnp.float32)
    out3_k = jax.block_until_ready(
        lora_linear(x3, lora_A3, lora_B3, k_block=128))
    ref3 = x3 @ lora_A3.T @ lora_B3.T
    assert out3_k.shape == ref3.shape
    assert jnp.allclose(out3_k, ref3, atol=3e-2, rtol=3e-2)

    print("KERNEL_OK")
</pallas_src>

<mosaic_0001>
module attributes {stable_mosaic.version = 11 : i64} {
  func.func @_lora_kernel(%arg0: i32, %arg1: i32, %arg2: memref<16x32xbf16, #tpu.memory_space<vmem>>, %arg3: memref<32x16xbf16, #tpu.memory_space<vmem>>, %arg4: memref<16x128xbf16, #tpu.memory_space<vmem>>, %arg5: memref<16x128xf32, #tpu.memory_space<vmem>>, %arg6: memref<16x16xf32, #tpu.memory_space<vmem>>) attributes {dimension_semantics = [#tpu.dimension_semantics<parallel>, #tpu.dimension_semantics<arbitrary>], iteration_bounds = array<i64: 1, 1>, scalar_prefetch = 0 : i64, scratch_operands = 1 : i64, tpu.core_type = #tpu.core_type<tc>, window_params = [{transform_indices = @transform_0, window_bounds = array<i64: 16, 32>}, {transform_indices = @transform_1, window_bounds = array<i64: 32, 16>}, {pipeline_mode = #tpu.pipeline_mode<synchronous>, transform_indices = @transform_2, window_bounds = array<i64: 16, 128>}, {transform_indices = @transform_3, window_bounds = array<i64: 16, 128>}]} {
    %c0_i32 = arith.constant 0 : i32
    %0 = arith.cmpi eq, %arg1, %c0_i32 : i32
    %1 = arith.extui %0 : i1 to i32
    %c0_i32_0 = arith.constant 0 : i32
    %2 = arith.cmpi ne, %1, %c0_i32_0 : i32
    scf.if %2 {
      %cst_10 = arith.constant 0.000000e+00 : f32
      %12 = vector.broadcast %cst_10 : f32 to vector<16x16xf32>
      %c0_11 = arith.constant 0 : index
      %c0_12 = arith.constant 0 : index
      %13 = vector.load %arg6[%c0_11, %c0_12] : memref<16x16xf32, #tpu.memory_space<vmem>>, vector<16x16xf32>
      tpu.vector_store %arg6[%c0_11, %c0_12], %12 {strides = array<i32>} : memref<16x16xf32, #tpu.memory_space<vmem>>, vector<16x16xf32>,
    } else {
    }
    %c0 = arith.constant 0 : index
    %c0_1 = arith.constant 0 : index
    %3 = vector.load %arg6[%c0, %c0_1] : memref<16x16xf32, #tpu.memory_space<vmem>>, vector<16x16xf32>
    %c0_2 = arith.constant 0 : index
    %c0_3 = arith.constant 0 : index
    %4 = vector.load %arg2[%c0_2, %c0_3] : memref<16x32xbf16, #tpu.memory_space<vmem>>, vector<16x32xbf16>
    %c0_4 = arith.constant 0 : index
    %c0_5 = arith.constant 0 : index
    %5 = vector.load %arg3[%c0_4, %c0_5] : memref<32x16xbf16, #tpu.memory_space<vmem>>, vector<32x16xbf16>
    %cst = arith.constant dense<0.000000e+00> : vector<16x16xf32>
    %6 = tpu.matmul %4, %5, %cst {dimension_numbers = #tpu.dot_dimension_numbers<[1], [0], [0], [1], [0, 0, 1, 1], [], []>} : vector<16x32xbf16>, vector<32x16xbf16>, vector<16x16xf32> -> vector<16x16xf32>
    %7 = arith.addf %3, %6 : vector<16x16xf32>
    %c0_6 = arith.constant 0 : index
    %c0_7 = arith.constant 0 : index
    %8 = vector.load %arg6[%c0_6, %c0_7] : memref<16x16xf32, #tpu.memory_space<vmem>>, vector<16x16xf32>
    tpu.vector_store %arg6[%c0_6, %c0_7], %7 {strides = array<i32>} : memref<16x16xf32, #tpu.memory_space<vmem>>, vector<16x16xf32>,
    %c0_i32_8 = arith.constant 0 : i32
    %9 = arith.cmpi eq, %arg1, %c0_i32_8 : i32
    %10 = arith.extui %9 : i1 to i32
    %c0_i32_9 = arith.constant 0 : i32
    %11 = arith.cmpi ne, %10, %c0_i32_9 : i32
    scf.if %11 {
      %c0_10 = arith.constant 0 : index
      %c0_11 = arith.constant 0 : index
      %12 = vector.load %arg6[%c0_10, %c0_11] : memref<16x16xf32, #tpu.memory_space<vmem>>, vector<16x16xf32>
      %13 = arith.truncf %12 : vector<16x16xf32> to vector<16x16xbf16>
      %c0_12 = arith.constant 0 : index
      %c0_13 = arith.constant 0 : index
      %14 = vector.load %arg4[%c0_12, %c0_13] : memref<16x128xbf16, #tpu.memory_space<vmem>>, vector<16x128xbf16>
      %cst_14 = arith.constant dense<0.000000e+00> : vector<16x128xf32>
      %15 = tpu.matmul %13, %14, %cst_14 {dimension_numbers = #tpu.dot_dimension_numbers<[1], [0], [0], [1], [0, 0, 1, 1], [], []>} : vector<16x16xbf16>, vector<16x128xbf16>, vector<16x128xf32> -> vector<16x128xf32>
      %c0_15 = arith.constant 0 : index
      %c0_16 = arith.constant 0 : index
      %16 = vector.load %arg5[%c0_15, %c0_16] : memref<16x128xf32, #tpu.memory_space<vmem>>, vector<16x128xf32>
      tpu.vector_store %arg5[%c0_15, %c0_16], %15 {strides = array<i32>} : memref<16x128xf32, #tpu.memory_space<vmem>>, vector<16x128xf32>,
    } else {
    }
    return
  }
  func.func @transform_0(%arg0: i32, %arg1: i32) -> (i32, i32) {
    %c0_i32 = arith.constant 0 : i32
    return %arg0, %arg1 : i32, i32
  }
  func.func @transform_1(%arg0: i32, %arg1: i32) -> (i32, i32) {
    %c0_i32 = arith.constant 0 : i32
    %c0_i32_0 = arith.constant 0 : i32
    return %arg1, %c0_i32 : i32, i32
  }
  func.func @transform_2(%arg0: i32, %arg1: i32) -> (i32, i32) {
    %c0_i32 = arith.constant 0 : i32
    %c0_i32_0 = arith.constant 0 : i32
    %c0_i32_1 = arith.constant 0 : i32
    return %c0_i32, %c0_i32_0 : i32, i32
  }
  func.func @transform_3(%arg0: i32, %arg1: i32) -> (i32, i32) {
    %c0_i32 = arith.constant 0 : i32
    %c0_i32_0 = arith.constant 0 : i32
    return %arg0, %c0_i32 : i32, i32
  }
}

</mosaic_0001>

<bundles_post_ra>
// kernel: tpu_custom_call.1
= control target key start
LH: loop header
LB: loop body
LE: loop exit
PB: predicated region body
PF: predicated region fallthrough
CT: control target
= control target key end

     0   :  { %v230_v1 = vmov 0.0   ;;  %vm231_vm0 = vmmov 0   ;;  %vm20_vm1 = vcmask 130048   ;;  %s275_s0 = inlined_call_operand.vmem [shape: bf16[16,32], index: 0, kind: input, shape index: {}]   ;;  %s276_s1 = inlined_call_operand.vmem [shape: bf16[32,16], index: 1, kind: input, shape index: {}]   ;;  %s277_s2 = inlined_call_operand.vmem [shape: bf16[16,128], index: 2, kind: input, shape index: {}]   ;;  %s278_s3 = inlined_call_operand.hbm [shape: f32[16,128], index: 3, kind: output, shape index: {}]  }
   0x1   :  { %v204_v0 = vld [vmem:[%s276_s1 + $0x8] sm:$0xff]   ;;  %185 = vmatprep.subr.bf16.mxu0 %v230_v1  ;;  %193 = vmatprep.subr.bf16.mxu1 %v230_v1  ;;  %v205_v2 = vld [vmem:[%s276_s1] sm:$0xff]   ;;  %21 = vst.msk [vmem:[#allocation2] sm:$0xff] %vm20_vm1, %v230_v1  ;;  %22 = vst.msk [vmem:[#allocation2 + $0x8] sm:$0xff] %vm20_vm1, %v230_v1 }
   0x2   :  { %186 = vmatpush3.bf16.msra.mxu0 %v204_v0  ;;  %189 = vmatprep.mubr.msk.bf16.mxu0 %vm231_vm0, %v230_v1 }
   0x3   :  { %187 = vmatprep.subr.bf16.mxu0 %v230_v1  ;;  %195 = vmatprep.mubr.msk.bf16.mxu1 %vm231_vm0, %v230_v1 }
   0x4   :  { %8 = vsyncpa [#allocation4], 0  ;;  %v206_v3 = vld [vmem:[%s275_s0] sm:$0xff]   ;;  %vm48_vm2 = vcmask 261120   ;;  %s232_s0 = smov [#allocation3]  }
   0x5   :  { %v207_v4 = vld [vmem:[%s277_s2] sm:$0xff]   ;;  %s163_s1 = sshll.u32 %s232_s0, 4  ;;  %s164_s1 = int_to_ptr.vmem [resolvable:$true] %s163_s1 }
   0x6   :  { %188 = vmatpush3.bf16.msra.mxu0 %v205_v2  ;;  %194 = vmatpush3.bf16.msra.mxu1 %v207_v4  ;;  %s208_s2 = scalar_lea.vmem %s164_s1, 256  ;;  %p213_p1 = scmp.lt.s32.totalorder %s164_s1, %s164_s1 }
   0x7   :  { %p209_p0 = scmp.ne.s32.totalorder %s164_s1, %s208_s2  ;;  %p214_p2 = scmp.lt.s32.totalorder %s208_s2, %s208_s2 }
   0x8   :  { %v23_v5 = vld [vmem:[#allocation2] sm:$0xff]  ;;  %v24_v9 = vld [vmem:[#allocation2 + $0x8] sm:$0xff] }
   0x9   :  { %190 = vmatmul.mubr.msk.bf16.vlgmr.msra.gmra.mxu0 %vm48_vm2, %v206_v3  ;;  %p215_p3 = por %p214_p2, %p213_p1 }
   0xb   :  { %p216_p4 = pnand %p215_p3, %p209_p0 }
  0xc9   :  { %v86_v6 = vpop.f32.mrf.mxu0 }
  0xca   :  { %v93_v7 = vadd.f32 %v86_v6, %v23_v5 }
  0xcb   :  { %v191_v8 = vpop.f32.mrf.mxu0 }
  0xcc   :  { %96 = vst.msk [vmem:[#allocation2] sm:$0xff] %vm20_vm1, %v93_v7 }
  0xcd   :  { %v89_v10 = vpop.f32.mrf.mxu0 }
  0xce   :  { %v94_v11 = vadd.f32 %v89_v10, %v24_v9 }
  0xcf   :  { %v192_v12 = vpop.f32.mrf.mxu0 }
  0xd0   :  { %97 = vst.msk [vmem:[#allocation2 + $0x8] sm:$0xff] %vm20_vm1, %v94_v11 }
  0xd3   :  { %v101_v13 = vld [vmem:[#allocation2] sm:$0xff] }
  0xd7   :  { %v102_v14 = vld [vmem:[#allocation2 + $0x8] sm:$0xff] }
  0xd8   :  { %v103_v15 = vpack.c.bf16 %v102_v14, %v101_v13 }
  0xda   :  { %196 = vmatmul.mubr.msk.bf16.vlgmr.msra.gmra.mxu1 %vm20_vm1, %v103_v15 }
 0x19a   :  { %v149_v16 = vpop.f32.mrf.mxu1 }
 0x19b   :  { %156 = vst [vmem:[#allocation3] sm:$0xff] %v149_v16 }
 0x19c   :  { %v197_v17 = vpop.f32.mrf.mxu1 }
 0x19e   :  { %v152_v18 = vpop.f32.mrf.mxu1 }
 0x19f   :  { %157 = vst [vmem:[#allocation3 + $0x8] sm:$0xff] %v152_v18 }
 0x1a0   :  { %v198_v19 = vpop.f32.mrf.mxu1 }
 0x1a1   :  { %219 = shalt.err (!%p216_p4)
}
 0x1a2   :  { %s233_s20 = smov 128   ;;  %s234_s21 = smov 8  }
 0x1a3   :  { %169 = dma.vmem_to_hbm [thread:$0]  %s164_s1, 256, %s278_s3, [#allocation4], %s233_s20, %s233_s20, %s234_s21  }
 0x1a4   :  { %228 = dma.done.wait [#allocation4], 256  }
 0x1a5   :  { %229 = vsyncadd [#allocation4], 4294967040 }
 0x1a6   :  { %173 = vsyncpa [#allocation4], 1 }

</bundles_post_ra>
